<compile_context>
chip_gen: v7x
topology: tpu7x:2x2x1
jax: 0.10.0
libtpu: 0.0.40
codegen_flags: <defaults>
</compile_context>

<pallas_src>
import jax
import jax.numpy as jnp
from jax import lax
from jax.experimental import pallas as pl
from jax.experimental.pallas import tpu as pltpu


_HEADROOM = 2 << 20
_NEG_INF_PAD = -1e30  # bias padding for vocab columns added by V-tiling


def _round_up(x, m):
    return ((x + m - 1) // m) * m


def _itemsize(dt):
    return jnp.dtype(dt).itemsize


def _vmem_caps():
    """(usable budget, vmem_limit ceiling) derived from the chip's VMEM."""
    cap = 64 << 20  # conservative fallback == v7x physical VMEM per TC
    try:
        cap = int(pltpu.get_tpu_info().vmem_capacity_bytes)
    except Exception:
        pass
    budget = max(cap - (16 << 20), 24 << 20)   # leave room for Mosaic scratch
    ceiling = max(cap - (4 << 20), 28 << 20)
    return budget, ceiling


def _clamp_vmem_limit(needed, ceiling):
    return int(min(max(needed + (4 << 20), 32 << 20), ceiling))


def _fit_tm(avail_bytes, per_row_bytes, tm_cap, m_rows):
    """Largest 8-aligned row tile whose per-row footprint fits avail_bytes."""
    cap = min(int(tm_cap), _round_up(m_rows, 8))
    if avail_bytes <= 0 or avail_bytes < 8 * per_row_bytes:
        return 0
    return int(min(cap, (avail_bytes // per_row_bytes) // 8 * 8))


def _ensure_two_row_steps(tm, m_rows):
    """v7x has 2 TensorCores; keep >= 2 row-grid steps whenever M allows."""
    if m_rows > 8 and _round_up(m_rows, tm) // tm < 2:
        tm = max(8, _round_up((m_rows + 1) // 2, 8))
    return tm


# ----------------------------------------------------------------------------
# Kernels
# ----------------------------------------------------------------------------

def _resident_kernel(x_ref, w_ref, b_ref, o_ref):
    # x: (tm, D)   w: (D, V)   b: (1, V) f32   o: (tm, V)
    logits = lax.dot_general(
        x_ref[...], w_ref[...],
        dimension_numbers=(((1,), (0,)), ((), ())),
        preferred_element_type=jnp.float32)
    logits = logits + b_ref[...]
    m = jnp.max(logits, axis=-1, keepdims=True)
    shifted = logits - m
    lse = jnp.log(jnp.sum(jnp.exp(shifted), axis=-1, keepdims=True))
    o_ref[...] = (shifted - lse).astype(o_ref.dtype)


def _vtiled_kernel(x_ref, w_ref, b_ref, o_ref, logits_sc, m_sc, l_sc):
    # Grid: (row tile i, pass p in {0,1}, vocab tile j)
    #   pass 0: logits tile -> scratch, update running max / log-sum-exp
    #   pass 1: o[j] = logits[j] - (m + log l)   (lane-dense streaming writes)
    p = pl.program_id(1)
    j = pl.program_id(2)

    @pl.when(jnp.logical_and(p == 0, j == 0))
    def _():
        m_sc[...] = jnp.full_like(m_sc, -jnp.inf)
        l_sc[...] = jnp.zeros_like(l_sc)

    @pl.when(p == 0)
    def _():
        s = lax.dot_general(
            x_ref[...], w_ref[...],
            dimension_numbers=(((1,), (0,)), ((), ())),
            preferred_element_type=jnp.float32)
        s = s + b_ref[...]
        logits_sc[j] = s
        m_prev = m_sc[...]
        m_new = jnp.maximum(m_prev, jnp.max(s, axis=-1, keepdims=True))
        l_sc[...] = (l_sc[...] * jnp.exp(m_prev - m_new)
                     + jnp.sum(jnp.exp(s - m_new), axis=-1, keepdims=True))
        m_sc[...] = m_new

    @pl.when(p == 1)
    def _():
        lse = m_sc[...] + jnp.log(l_sc[...])
        o_ref[...] = (logits_sc[j] - lse).astype(o_ref.dtype)


# ----------------------------------------------------------------------------
# pallas_call builders
# ----------------------------------------------------------------------------

def _build_resident(M_pad, D, V, tm, mxu_dt, out_dt, vmem_ceiling,
                    single_buffer):
    x_spec = pl.BlockSpec((tm, D), lambda i: (i, 0))
    out_spec = pl.BlockSpec((tm, V), lambda i: (i, 0))
    if single_buffer:
        # Constant-index param blocks: one buffer is enough.
        w_spec = pl.BlockSpec((D, V), lambda i: (0, 0),
                              pipeline_mode=pl.Buffered(1))
        b_spec = pl.BlockSpec((1, V), lambda i: (0, 0),
                              pipeline_mode=pl.Buffered(1))
        n_param = 1
    else:
        w_spec = pl.BlockSpec((D, V), lambda i: (0, 0))
        b_spec = pl.BlockSpec((1, V), lambda i: (0, 0))
        n_param = 2

    V128 = _round_up(V, 128)
    needed = (n_param * (D * V128 * _itemsize(mxu_dt) + 8 * V128 * 4)
              + tm * (2 * D * _itemsize(mxu_dt)          # x tiles (double-buf)
                      + 2 * V128 * _itemsize(out_dt)     # out tiles (double-buf)
                      + 2 * V128 * 4)                    # f32 logits + temp
              + _HEADROOM)

    return pl.pallas_call(
        _resident_kernel,
        out_shape=jax.ShapeDtypeStruct((M_pad, V), out_dt),
        grid_spec=pltpu.PrefetchScalarGridSpec(
            num_scalar_prefetch=0,
            grid=(M_pad // tm,),
            in_specs=[x_spec, w_spec, b_spec],
            out_specs=out_spec,
        ),
        compiler_params=pltpu.CompilerParams(
            dimension_semantics=("parallel",),
            vmem_limit_bytes=_clamp_vmem_limit(needed, vmem_ceiling),
        ),
    )


def _build_vtiled(M_pad, D, V_pad, tm, tv, mxu_dt, out_dt, vmem_ceiling):
    nj = V_pad // tv
    grid = (M_pad // tm, 2, nj)

    x_spec = pl.BlockSpec((tm, D), lambda i, p, j: (i, 0))
    # During pass 1 the weight/bias block index collapses to (0, 0) so the
    # full weight is streamed from HBM only once per row tile (during pass 0).
    w_spec = pl.BlockSpec((D, tv), lambda i, p, j: (0, j * (1 - p)))
    b_spec = pl.BlockSpec((1, tv), lambda i, p, j: (0, j * (1 - p)))
    # During pass 0 the output block index stays (i, 0); its buffer is only
    # written back to HBM after pass 1 has overwritten it with real values.
    out_spec = pl.BlockSpec((tm, tv), lambda i, p, j: (i, j * p))

    needed = (tm * V_pad * 4                              # f32 logits scratch
              + 2 * D * tv * _itemsize(mxu_dt)            # streamed W blocks
              + 2 * 8 * tv * 4                            # bias blocks
              + tm * (2 * D * _itemsize(mxu_dt)
                      + 2 * tv * _itemsize(out_dt)
                      + 2 * tv * 4)                       # per-tile f32 temps
              + _HEADROOM)

    return pl.pallas_call(
        _vtiled_kernel,
        out_shape=jax.ShapeDtypeStruct((M_pad, V_pad), out_dt),
        grid_spec=pltpu.PrefetchScalarGridSpec(
            num_scalar_prefetch=0,
            grid=grid,
            in_specs=[x_spec, w_spec, b_spec],
            out_specs=out_spec,
            scratch_shapes=[
                pltpu.VMEM((nj, tm, tv), jnp.float32),    # logits
                pltpu.VMEM((tm, 1), jnp.float32),         # running max
                pltpu.VMEM((tm, 1), jnp.float32),         # running sum
            ],
        ),
        compiler_params=pltpu.CompilerParams(
            dimension_semantics=("parallel", "arbitrary", "arbitrary"),
            vmem_limit_bytes=_clamp_vmem_limit(needed, vmem_ceiling),
        ),
    )


# ----------------------------------------------------------------------------
# Public wrapper
# ----------------------------------------------------------------------------

def generator_forward(x, weight, bias, *, tm=256, tv=512, out_dtype=None,
                      mxu_dtype="auto", force_vtiled=False):
    """log_softmax(x @ weight.T + bias, axis=-1)  (PyTorch `Generator.forward`).

    x: [B, S, D]; weight: [V, D] (nn.Linear layout); bias: [V].
    Returns [B, S, V] in `out_dtype` (default: x.dtype). For loss/KL use pass
    out_dtype=jnp.float32 (bf16 log-probs keep ~2-3 significant digits); note
    f32 output doubles HBM writeback, the largest stream in this kernel.
    mxu_dtype: dtype fed to the MXU ("auto" -> bfloat16; pass jnp.float32 to
    force the slower multi-pass f32 matmul when bit-accuracy matters).
    """
    B, S, D = x.shape
    V, Dw = weight.shape
    assert Dw == D, "weight must be [vocab, d_model]"
    out_dt = jnp.dtype(out_dtype or x.dtype)
    mxu_dt = jnp.bfloat16 if mxu_dtype == "auto" else jnp.dtype(mxu_dtype)

    budget, ceiling = _vmem_caps()
    M = B * S

    # One-time HBM-side transpose+cast to [D, V]: the kernel contracts
    # (1,)x(0,) and never transposes the weight block on the XLU per tile.
    w_t = weight.T.astype(mxu_dt)                  # [D, V]
    x2d = x.reshape(M, D).astype(mxu_dt)
    b_f32 = bias.astype(jnp.float32)

    V128 = _round_up(V, 128)

    # --- resident-weight path sizing ---------------------------------------
    fixed_res = D * V128 * _itemsize(mxu_dt) + 8 * V128 * 4 + _HEADROOM
    per_row_res = (2 * D * _itemsize(mxu_dt)
                   + 2 * V128 * _itemsize(out_dt)
                   + 2 * V128 * 4)                 # f32 logits + one temp slab
    tm_res = _fit_tm(budget - fixed_res, per_row_res, tm, M)
    use_resident = (not force_vtiled) and tm_res >= min(64, _round_up(M, 8))

    if use_resident:
        tm_eff = _ensure_two_row_steps(tm_res, M)
        M_pad = _round_up(M, tm_eff)
        xp = jnp.pad(x2d, ((0, M_pad - M), (0, 0))) if M_pad != M else x2d
        b2d = b_f32.reshape(1, V)

        def run(single_buffer):
            fn = _build_resident(M_pad, D, V, tm_eff, mxu_dt, out_dt, ceiling,
                                 single_buffer)
            return fn(xp, w_t, b2d)

        if hasattr(pl, "Buffered"):
            try:
                out = run(True)
            except Exception as e:  # narrow fallback: Buffered(1) unsupported
                msg = "%s: %s" % (type(e).__name__, e)
                if (isinstance(e, NotImplementedError)
                        or "Buffered" in msg or "buffer_count" in msg
                        or "pipeline_mode" in msg):
                    out = run(False)
                else:
                    raise
        else:
            out = run(False)
        return out[:M].reshape(B, S, V)

    # --- V-tiled streaming path (large vocab / v7x) -------------------------
    tv_eff = min(_round_up(tv, 128), _round_up(V, 128))
    V_pad = _round_up(V, tv_eff)
    fixed_vt = (2 * D * tv_eff * _itemsize(mxu_dt) + 2 * 8 * tv_eff * 4
                + _HEADROOM)
    per_row_vt = (V_pad * 4
                  + 2 * D * _itemsize(mxu_dt)
                  + 2 * tv_eff * _itemsize(out_dt)
                  + 2 * tv_eff * 4)
    tm_vt = _fit_tm(budget - fixed_vt, per_row_vt, tm, M)
    if tm_vt < 8:
        raise ValueError(
            "vocab too large for the V-tiled path at tv=%d; pass a smaller tv "
            "or bf16 weights" % tv_eff)
    tm_eff = _ensure_two_row_steps(tm_vt, M)
    M_pad = _round_up(M, tm_eff)

    xp = jnp.pad(x2d, ((0, M_pad - M), (0, 0))) if M_pad != M else x2d
    wp = jnp.pad(w_t, ((0, 0), (0, V_pad - V))) if V_pad != V else w_t
    b2d = b_f32.reshape(1, V)
    if V_pad != V:
        # Padded vocab columns get a huge negative bias so they never affect
        # the running max / log-sum-exp; they are sliced off below.
        b2d = jnp.pad(b2d, ((0, 0), (0, V_pad - V)),
                      constant_values=_NEG_INF_PAD)

    fn = _build_vtiled(M_pad, D, V_pad, tm_eff, tv_eff, mxu_dt, out_dt, ceiling)
    out = fn(xp, wp, b2d)
    return out[:M, :V].reshape(B, S, V)


# ----------------------------------------------------------------------------
# Self-test
# ----------------------------------------------------------------------------

if __name__ == "__main__":
    key = jax.random.PRNGKey(0)
    k1, k2, k3, k4, k5, k6 = jax.random.split(key, 6)

    # Small shapes consistent with the module: d_model=32, vocab=128.
    B, S, D, V = 2, 8, 32, 128
    x = jax.random.normal(k1, (B, S, D), dtype=jnp.float32)
    weight = jax.random.normal(k2, (V, D), dtype=jnp.float32) * 0.05
    bias = jax.random.normal(k3, (V,), dtype=jnp.float32) * 0.05
    ref = jax.nn.log_softmax(x @ weight.T + bias, axis=-1)

    # 1) exact f32 MXU path (resident-weight path).
    out = generator_forward(x, weight, bias, mxu_dtype=jnp.float32)
    jax.block_until_ready(out)
    assert out.shape == (B, S, V)
    assert jnp.allclose(out, ref, atol=1e-4, rtol=1e-4)

    # 2) default path: bf16 MXU operands, f32 softmax, f32 output.
    out_bf = generator_forward(x, weight, bias)
    jax.block_until_ready(out_bf)
    assert jnp.allclose(out_bf, ref, atol=3e-2, rtol=3e-2)

    # 3) bf16 inputs end-to-end.
    out_b16 = generator_forward(x.astype(jnp.bfloat16),
                                weight.astype(jnp.bfloat16),
                                bias.astype(jnp.bfloat16))
    jax.block_until_ready(out_b16)
    assert jnp.allclose(out_b16.astype(jnp.float32), ref, atol=1e-1, rtol=1e-1)

    # 4) V-tiled streaming path (forced at small scale), incl. vocab padding.
    B2, S2, D2, V2 = 4, 24, 64, 640
    x2 = jax.random.normal(k4, (B2, S2, D2), dtype=jnp.float32)
    w2 = jax.random.normal(k5, (V2, D2), dtype=jnp.float32) * 0.05
    b2 = jax.random.normal(k6, (V2,), dtype=jnp.float32) * 0.05
    ref2 = jax.nn.log_softmax(x2 @ w2.T + b2, axis=-1)
    out2 = generator_forward(x2, w2, b2, mxu_dtype=jnp.float32,
                             force_vtiled=True, tm=32, tv=256)
    jax.block_until_ready(out2)
    assert out2.shape == (B2, S2, V2)
    assert jnp.allclose(out2, ref2, atol=1e-4, rtol=1e-4)

    print("KERNEL_OK")
</pallas_src>

<mosaic_0001>
module attributes {stable_mosaic.version = 11 : i64} {
  func.func @_resident_kernel(%arg0: i32, %arg1: memref<8x32xf32, #tpu.memory_space<vmem>>, %arg2: memref<32x128xf32, #tpu.memory_space<vmem>>, %arg3: memref<1x128xf32, #tpu.memory_space<vmem>>, %arg4: memref<8x128xf32, #tpu.memory_space<vmem>>) attributes {dimension_semantics = [#tpu.dimension_semantics<parallel>], iteration_bounds = array<i64: 2>, scalar_prefetch = 0 : i64, scratch_operands = 0 : i64, tpu.core_type = #tpu.core_type<tc>, window_params = [{transform_indices = @transform_0, window_bounds = array<i64: 8, 32>}, {pipeline_mode = #tpu.pipeline_mode<synchronous>, transform_indices = @transform_1, window_bounds = array<i64: 32, 128>}, {pipeline_mode = #tpu.pipeline_mode<synchronous>, transform_indices = @transform_2, window_bounds = array<i64: 1, 128>}, {transform_indices = @transform_3, window_bounds = array<i64: 8, 128>}]} {
    %c0 = arith.constant 0 : index
    %c0_0 = arith.constant 0 : index
    %0 = vector.load %arg1[%c0, %c0_0] : memref<8x32xf32, #tpu.memory_space<vmem>>, vector<8x32xf32>
    %c0_1 = arith.constant 0 : index
    %c0_2 = arith.constant 0 : index
    %1 = vector.load %arg2[%c0_1, %c0_2] : memref<32x128xf32, #tpu.memory_space<vmem>>, vector<32x128xf32>
    %cst = arith.constant dense<0.000000e+00> : vector<8x128xf32>
    %2 = tpu.matmul %0, %1, %cst {dimension_numbers = #tpu.dot_dimension_numbers<[1], [0], [0], [1], [0, 0, 1, 1], [], []>} : vector<8x32xf32>, vector<32x128xf32>, vector<8x128xf32> -> vector<8x128xf32>
    %c0_3 = arith.constant 0 : index
    %c0_4 = arith.constant 0 : index
    %3 = vector.load %arg3[%c0_3, %c0_4] : memref<1x128xf32, #tpu.memory_space<vmem>>, vector<1x128xf32>
    %4 = vector.broadcast %3 : vector<1x128xf32> to vector<8x128xf32>
    %5 = arith.addf %2, %4 : vector<8x128xf32>
    %cst_5 = arith.constant dense<0xFF800000> : vector<8xf32>
    %6 = vector.multi_reduction <maximumf>, %5, %cst_5 [1] : vector<8x128xf32> to vector<8xf32>
    %7 = vector.shape_cast %6 : vector<8xf32> to vector<8x1xf32>
    %8 = vector.broadcast %7 : vector<8x1xf32> to vector<8x128xf32>
    %9 = arith.subf %5, %8 : vector<8x128xf32>
    %10 = math.exp %9 : vector<8x128xf32>
    %cst_6 = arith.constant dense<0.000000e+00> : vector<8xf32>
    %11 = vector.multi_reduction <add>, %10, %cst_6 [1] : vector<8x128xf32> to vector<8xf32>
    %12 = vector.shape_cast %11 : vector<8xf32> to vector<8x1xf32>
    %13 = math.log %12 : vector<8x1xf32>
    %14 = vector.broadcast %13 : vector<8x1xf32> to vector<8x128xf32>
    %15 = arith.subf %9, %14 : vector<8x128xf32>
    %c0_7 = arith.constant 0 : index
    %c0_8 = arith.constant 0 : index
    %16 = vector.load %arg4[%c0_7, %c0_8] : memref<8x128xf32, #tpu.memory_space<vmem>>, vector<8x128xf32>
    tpu.vector_store %arg4[%c0_7, %c0_8], %15 {strides = array<i32>} : memref<8x128xf32, #tpu.memory_space<vmem>>, vector<8x128xf32>,
    return
  }
  func.func @transform_0(%arg0: i32) -> (i32, i32) {
    %c0_i32 = arith.constant 0 : i32
    %c0_i32_0 = arith.constant 0 : i32
    return %arg0, %c0_i32 : i32, i32
  }
  func.func @transform_1(%arg0: i32) -> (i32, i32) {
    %c0_i32 = arith.constant 0 : i32
    %c0_i32_0 = arith.constant 0 : i32
    %c0_i32_1 = arith.constant 0 : i32
    return %c0_i32, %c0_i32_0 : i32, i32
  }
  func.func @transform_2(%arg0: i32) -> (i32, i32) {
    %c0_i32 = arith.constant 0 : i32
    %c0_i32_0 = arith.constant 0 : i32
    %c0_i32_1 = arith.constant 0 : i32
    return %c0_i32, %c0_i32_0 : i32, i32
  }
  func.func @transform_3(%arg0: i32) -> (i32, i32) {
    %c0_i32 = arith.constant 0 : i32
    %c0_i32_0 = arith.constant 0 : i32
    return %arg0, %c0_i32 : i32, i32
  }
}

</mosaic_0001>

<bundles_post_ra>
// kernel: tpu_custom_call.1
= control target key start
LH: loop header
LB: loop body
LE: loop exit
PB: predicated region body
PF: predicated region fallthrough
CT: control target
= control target key end

     0   :  { %8 = vsyncpa [#allocation3], 0  ;;  %s857_s0 = inlined_call_operand.hbm [shape: f32[16,32], index: 0, kind: input, shape index: {}]   ;;  %s858_s1 = inlined_call_operand.hbm [shape: f32[32,128], index: 1, kind: input, shape index: {}]   ;;  %s859_s2 = inlined_call_operand.vmem [shape: f32[1,128], index: 2, kind: input, shape index: {}]   ;;  %s860_s3 = inlined_call_operand.hbm [shape: f32[16,128], index: 3, kind: output, shape index: {}]  }
   0x1   :  { %10 = vsyncpa [#allocation3 + $0x1], 0 }
   0x2   :  { %11 = vsyncpa [#allocation6], 0 }
   0x3   :  { %12 = vsyncpa [#allocation4], 0 }
   0x4   :  { %14 = vsyncpa [#allocation4 + $0x1], 0  ;;  %s654_s12 = smov 0   ;;  %s656_s13 = smov 0  }
   0x5   :  { %s658_s14 = smov 0   ;;  %s660_s15 = smov 0  }
   0x6 LB: > { %s675_s16 = sadd.s32 4294967295, %s624_s15   ;;  %s392_s17 = sadd.s32 4294967294, %s624_s15   ;;  %s624_s15 = sphi %s660_s15, %s880_s15   ;;  %s620_s14 = sphi %s658_s14, %s879_s14   ;;  %s616_s13 = sphi %s656_s13, %s878_s13   ;;  %s612_s12 = sphi %s654_s12, %s877_s12  }
   0x7   : > { %p40_p0 = scmp.ne.s32.totalorder %s616_s13, %s612_s12  ;;  %p861_p1 = scmp.eq.s32.totalorder %s675_s16, 0 }
   0x8   : > { %p112_p3 = scmp.eq.s32.totalorder %s392_s17, 1  ;;  %p393_p5 = scmp.ge.s32.totalorder %s624_s15, 1 }
   0x9   : > { %p684_p4 = por %p861_p1, %p40_p0  ;;  %p119_p7 = scmp.lt.s32.totalorder %s624_s15, 3 }
   0xa   : > { %p689_p6 = por %p112_p3, %p40_p0  ;;  %s626_s21 = smov [#allocation5]  }
   0xb   : > { %s864_s18 = scalar_select %p684_p4, 1, 0 }
   0xc   : > { %s865_s19 = scalar_select %p689_p6, 1, 0 }
   0xd   : > { %p694_p8 = pnand %p393_p5, %p119_p7  ;;  %s131_s22 = sshll.u32 %s626_s21, 4  ;;  %s698_s22 = int_to_ptr.vmem [resolvable:$true] %s131_s22 }
   0xe   : > { %s710_s24 = sadd.s32 1, %s624_s15   ;;  %s27_s25 = sadd.s32 1, %s620_s14 }
   0xf   : > { %s866_s20 = scalar_select %p694_p8, 1, 0 }
  0x10   : > { %p438_p9 = pneg %p694_p8  ;;  %s24_s26 = ssub.s32 %s624_s15, %s710_s24 }
  0x11   : > { %s496_s29 = scalar_lea.hbm %s858_s1, 512 }
  0x12   : > { %p705_p11 = pnand %p438_p9, %p861_p1  ;;  %p497_p12 = scmp.ne.s32.totalorder %s858_s1, %s496_s29 }
  0x13   : > { %p503_p5 = scmp.lt.u32.totalorder %s496_s29, %s858_s1 }
  0x14   : > { %p498_p13 = pneg %p705_p11 }
  0x16   : > { %p499_p0 = pnand %p498_p13, %p497_p12 }
  0x18   : > { %p500_p3 = pneg %p499_p0 }
  0x1a   : > { %p505_p7 = pnand %p503_p5, %p500_p3 }
  0x1c   : > { %508 = shalt.err (!%p505_p7)
}
  0x1d   : > { %s509_s7 = scalar_lea.vmem %s698_s22, 512  ;;  %p517_p2 = scmp.lt.s32.totalorder %s698_s22, %s698_s22 }
  0x1e   : > { %p510_p9 = scmp.ne.s32.totalorder %s698_s22, %s509_s7  ;;  %p518_p6 = scmp.lt.s32.totalorder %s509_s7, %s509_s7 }
  0x20   : > { %p512_p10 = pnand %p510_p9, %p498_p13  ;;  %p519_p4 = por %p518_p6, %p517_p2 }
  0x22   : > { %p513_p1 = pneg %p512_p10 }
  0x24   : > { %p520_p8 = pnand %p519_p4, %p513_p1 }
  0x26   : > { %523 = shalt.err (!%p520_p8)
}
  0x27   : > { %s627_s8 = smov 128   ;;  %s628_s9 = smov 8  }
  0x28   : > { %441 = dma.hbm_to_vmem [thread:$0]  (!%p705_p11), %s858_s1, 512, %s698_s22, [#allocation6], %s627_s8, %s627_s8, %s628_s9  }
  0x29   : > { %p25_p2 = scmp.eq.s32.totalorder %s24_s26, 0  ;;  %p34_p1 = scmp.ne.s32.totalorder %s620_s14, %s616_s13 }
  0x2a   : > { %p35_p4 = scmp.eq.s32.totalorder %s624_s15, 0  ;;  %p451_p6 = scmp.lt.s32.totalorder %s624_s15, 2 }
  0x2b   : > { %s741_s17 = scalar_select %p25_p2, %s620_s14, %s27_s25  }
  0x2c   : > { %p36_p8 = por %p35_p4, %p34_p1  ;;  %p868_p10 = scmp.eq.s32.totalorder %s675_s16, 1 }
  0x2d   : > { %s148_s27 = sand.u32 1, %s620_s14   ;;  %s397_s28 = sshll.u32 %s624_s15, 7 }
  0x2e   : > { %p745_p12 = por %p868_p10, %p34_p1  ;;  %s396_s29 = sshll.u32 %s148_s27, 3 }
  0x2f   : > { %s754_s4 = scalar_lea.hbm %s857_s0, %s397_s28  ;;  %s152_s22 = scalar_lea.vmem [#allocation2], %s396_s29 }
  0x30   : > { %s159_s25 = sshll.u32 %s152_s22, 4  ;;  %p756_p11 = pnand %p451_p6, %p36_p8  ;;  %s760_s25 = int_to_ptr.vmem [resolvable:$true] %s159_s25 }
  0x31   : > { %s149_s5 = scalar_lea.sflag [#allocation3], %s148_s27  ;;  %s524_s6 = scalar_lea.hbm %s754_s4, 128 }
  0x32   : > { %p525_p13 = scmp.ne.s32.totalorder %s754_s4, %s524_s6  ;;  %p526_p0 = pneg %p756_p11 }
  0x33   : > { %s529_s9 = scalar_lea.hbm %s857_s0, 256  ;;  %p530_p7 = scmp.lt.u32.totalorder %s754_s4, %s857_s0 }
  0x34   : > { %p527_p3 = pnand %p526_p0, %p525_p13  ;;  %p531_p9 = scmp.lt.u32.totalorder %s529_s9, %s524_s6 }
  0x35   : > { %p533_p1 = scmp.lt.u32.totalorder %s524_s6, %s754_s4 }
  0x36   : > { %p528_p5 = pneg %p527_p3  ;;  %p532_p2 = por %p531_p9, %p530_p7 }
  0x38   : > { %p534_p4 = por %p533_p1, %p532_p2 }
  0x3a   : > { %p535_p6 = pnand %p534_p4, %p528_p5 }
  0x3c   : > { %538 = shalt.err (!%p535_p6)
}
  0x3d   : > { %s539_s27 = scalar_lea.vmem %s760_s25, 128  ;;  %s629_s28 = smov [#allocation2]  }
  0x3e   : > { %p540_p8 = scmp.ne.s32.totalorder %s760_s25, %s539_s27  ;;  %s544_s29 = sshll.u32 %s629_s28, 4  ;;  %s545_s29 = int_to_ptr.vmem [resolvable:$false] %s544_s29 }
  0x3f   : > { %s546_s23 = scalar_lea.vmem %s545_s29, 256  ;;  %p547_p3 = scmp.lt.s32.totalorder %s760_s25, %s545_s29 }
  0x40   : > { %p542_p10 = pnand %p540_p8, %p526_p0  ;;  %p548_p7 = scmp.lt.s32.totalorder %s546_s23, %s539_s27 }
  0x42   : > { %p543_p13 = pneg %p542_p10  ;;  %p549_p9 = por %p548_p7, %p547_p3 }
  0x44   : > { %p550_p2 = pnand %p549_p9, %p543_p13 }
  0x46   : > { %553 = shalt.err (!%p550_p2)
}
  0x47   : > { %445 = dma.hbm_to_vmem [thread:$0]  (!%p756_p11), %s754_s4, 128, %s760_s25, %s149_s5  }
  0x48   : > { %p871_p5 = scmp.ne.s32.totalorder %s866_s20, 0 }
  0x49   : > { %s790_s30 = sand.u32 (!%p871_p5), 1, %s616_s13   ;;  %p872_p0 = scmp.ne.s32.totalorder (!%p871_p5), %s864_s18, 0 }
  0x4a   : > { %168 = sbr.rel (%p871_p5) target bundleno = 637 (0x27d), region = 32  ;;  %s399_s22 = sshll.u32 (!%p871_p5), %s790_s30, 3 }
  0x4b   : > { %s171_s6 = scalar_lea.sflag (!%p871_p5), [#allocation3], %s790_s30  ;;  %s174_s7 = scalar_lea.vmem (!%p871_p5), [#allocation2], %s399_s22 }
  0x51   : > { %599 = dma.done.wait (%p872_p0), %s171_s6, 128  }
  0x52   : > { %601 = vsyncadd (%p872_p0), %s171_s6, 4294967168  ;;  %p873_p11 = scmp.eq.s32.totalorder %s675_s16, 0 }
  0x54   : > { %603 = dma.done.wait (%p873_p11), [#allocation6], 512   ;;  %p874_p1 = pmov %p873_p11 }
  0x55   : > { %v630_v0 = vmov 0.0|0.0   ;;  %vm631_vm0 = vmmov 0   ;;  %v632_v1 = vmov 0.0   ;;  %v202_v2 = vld [vmem:[#allocation5] sm:$0xff]  ;;  %v203_v3 = vld [vmem:[#allocation5 + $0x8] sm:$0xff]  ;;  %v204_v4 = vld [vmem:[#allocation5 + $0x10] sm:$0xff] }
  0x56   : > { %605 = vsyncadd (%p874_p1), [#allocation6], 4294966784  ;;  %424 = vmatprep.subr.bf16.mxu0 %v630_v0  ;;  %421 = vmatprep.mubr.msk.f32.mxu0 %vm631_vm0, %v632_v1  ;;  %v425_v5 = vpack.c.bf16 %v203_v3, %v202_v2  ;;  %v205_v6 = vld [vmem:[#allocation5 + $0x18] sm:$0xff]  ;;  %vm213_vm1 = vcmask 261120   ;;  %v402_v9 = vld [vmem:[%s859_s2] ss:$0 sm:$0xff] }
  0x57   : > { %v428_v7 = vpack.c.bf16 %v205_v6, %v204_v4  ;;  %v201_v8 = vld [vmem:[%s174_s7] sm:$0xff]  ;;  %s405_s4 = sshll.u32 %s675_s16, 7  ;;  %s200_s25 = scalar_lea.vmem [#allocation7], %s399_s22 }
  0x58   : > { %426 = vmatpush3.bf16.msra.mxu0 %v425_v5  ;;  %s312_s26 = sshll.u32 %s200_s25, 4  ;;  %s813_s9 = scalar_lea.hbm %s860_s3, %s405_s4  ;;  %s815_s26 = int_to_ptr.vmem [resolvable:$true] %s312_s26 }
  0x59   : > { %427 = vmatprep.subr.bf16.mxu0 %v630_v0  ;;  %s299_s10 = scalar_lea.sflag [#allocation4], %s790_s30  ;;  %s554_s11 = scalar_lea.vmem %s815_s26, 128 }
  0x5a   : > { %p555_p4 = scmp.ne.s32.totalorder %s815_s26, %s554_s11  ;;  %s633_s16 = smov [#allocation7]  }
  0x5b   : > { %s558_s27 = sshll.u32 %s633_s16, 4  ;;  %s559_s27 = int_to_ptr.vmem [resolvable:$false] %s558_s27 }
  0x5c   : > { %429 = vmatpush3.bf16.msra.mxu0 %v428_v7  ;;  %p556_p6 = pnand %p555_p4, %p745_p12  ;;  %s560_s28 = scalar_lea.vmem %s559_s27, 256 }
  0x5d   : > { %p561_p10 = scmp.lt.s32.totalorder %s815_s26, %s559_s27  ;;  %p562_p13 = scmp.lt.s32.totalorder %s560_s28, %s554_s11 }
  0x5e   : > { %p557_p8 = pneg %p556_p6 }
  0x5f   : > { %422 = vmatmul.mubr.msk.f32.vlgmr.msra.gmra.mrb[0].mxu0 %vm213_vm1, %v201_v8  ;;  %p563_p3 = por %p562_p13, %p561_p10 }
  0x61   : > { %p564_p7 = pnand %p563_p3, %p557_p8 }
 0x132   : > { %v283_v10 = vpop.f32.mrb[0].mxu0 }
 0x133   : > { %v284_v11 = vadd.f32 %v402_v9, %v283_v10  ;;  %v423_v12 = vpop.f32.mrb[1].mxu0 }
 0x135   : > { %287 = vmax.xlane.f32.xlu0 %v284_v11 }
 0x1c2   : > { %v288_v13 = vpop.xlane.xlu0 %287 }
 0x1c3   : > { %v289_v14 = vsub.f32 %v284_v11, %v288_v13 }
 0x1c5   : > { %v290_v15 = vmul.f32 1.442695, %v289_v14 }
 0x1c7   : > { %492 = vpow2.f32 %v290_v15 }
 0x1d1   : > { %v493_v16 = vpop.eup %492 }
 0x1d2   : > { %292 = vadd.xlane.f32.xlu0 %v493_v16 }
 0x25f   : > { %v293_v17 = vpop.xlane.xlu0 %292 }
 0x260   : > { %494 = vlog2.f32 %v293_v17 }
 0x26a   : > { %v495_v18 = vpop.eup %494 }
 0x26b   : > { %v295_v19 = vmul.f32 0.6931472, %v495_v18 }
 0x26d   : > { %v296_v20 = vsub.f32 %v289_v14, %v295_v19 }
 0x26f   : > { %297 = vst [vmem:[%s200_s25] sm:$0xff] %v296_v20 }
 0x270   : > { %567 = shalt.err (!%p564_p7)
}
 0x271   : > { %s568_s29 = scalar_lea.hbm %s813_s9, 128  ;;  %s572_s22 = scalar_lea.hbm %s860_s3, 256 }
 0x272   : > { %p569_p9 = scmp.ne.s32.totalorder %s813_s9, %s568_s29  ;;  %p573_p0 = scmp.lt.u32.totalorder %s813_s9, %s860_s3 }
 0x273   : > { %p574_p11 = scmp.lt.u32.totalorder %s572_s22, %s568_s29  ;;  %p576_p4 = scmp.lt.u32.totalorder %s568_s29, %s813_s9 }
 0x274   : > { %p570_p2 = pnand %p569_p9, %p745_p12 }
 0x275   : > { %p575_p1 = por %p574_p11, %p573_p0 }
 0x276   : > { %p571_p5 = pneg %p570_p2 }
 0x277   : > { %p577_p6 = por %p576_p4, %p575_p1 }
 0x279   : > { %p578_p8 = pnand %p577_p6, %p571_p5 }
 0x27b   : > { %581 = shalt.err (!%p578_p8)
}
 0x27c   : > { %436 = dma.vmem_to_hbm [thread:$0]  (%p745_p12), %s815_s26, 128, %s813_s9, %s299_s10  }
 0x27d PF: > { %s324_s18 = sand.u32 1, %s612_s12   ;;  %p875_p10 = scmp.ne.s32.totalorder %s865_s19, 0 }
 0x27e   : > { %p876_p13 = scmp.ge.s32.totalorder %s624_s15, 2  ;;  %s325_s20 = scalar_lea.sflag [#allocation4], %s324_s18 }
 0x280   : > { %p447_p3 = pnand %p876_p13, %p875_p10 }
 0x282   : > { %607 = dma.done.wait (!%p447_p3), %s325_s20, 128  }
 0x283   : > { %609 = vsyncadd (!%p447_p3), %s325_s20, 4294967168  ;;  %p17_p7 = scmp.ge.s32.totalorder %s710_s24, 4   ;;  %s877_s12 = smov %s616_s13 }
 0x284   : > { %s878_s13 = smov %s620_s14  ;;  %s879_s14 = smov %s741_s17 }
 0x285   : > { %s880_s15 = smov %s710_s24  ;;  %19 = sbr.rel (!%p17_p7) target bundleno = 6 (0x6), region = 81 }
 0x28c   :  { %330 = vsyncpa [#allocation3], 1 }
 0x28d   :  { %332 = vsyncpa [#allocation3 + $0x1], 1 }
 0x28e   :  { %333 = vsyncpa [#allocation6], 1 }
 0x28f   :  { %334 = vsyncpa [#allocation4], 1 }
 0x290   :  { %336 = vsyncpa [#allocation4 + $0x1], 1 }

</bundles_post_ra>
